<compile_context>
chip_gen: v6e
topology: v6e:2x2x1
jax: 0.10.0
libtpu: 0.0.40
codegen_flags: <defaults>
</compile_context>

<pallas_src>
import functools

import jax
import jax.numpy as jnp
from jax import lax
from jax.experimental import pallas as pl
from jax.experimental.pallas import tpu as pltpu

_MIX1 = 0x9E3779B9
_MIX2 = 0x85EBCA6B
_MIX3 = 0xC2B2AE35


def _round_up(x, m):
    return (x + m - 1) // m * m


def _base_head_kernel(x_ref, w_ref, b_ref, o_ref, *, p, training, seed_mix,
                      tile_b, k_dim):
    """One batch tile: o = dropout(x) @ W^T + b (MXU, f32 accumulation)."""
    x = x_ref[...]                                   # (TB, K), native dtype

    if training and p > 0.0:
        # Inverted dropout via a stateless hash of the global element index.
        thresh = int(round(p * (1 << 24)))           # keep iff low24(h) >= thresh
        rows = (lax.broadcasted_iota(jnp.uint32, x.shape, 0)
                + (pl.program_id(0) * tile_b).astype(jnp.uint32))
        cols = lax.broadcasted_iota(jnp.uint32, x.shape, 1)
        h = rows * jnp.uint32(k_dim) + cols + jnp.uint32(seed_mix)
        h = h * jnp.uint32(_MIX1)
        h = (h ^ (h >> 16)) * jnp.uint32(_MIX2)
        h = (h ^ (h >> 13)) * jnp.uint32(_MIX3)
        h = h ^ (h >> 16)
        keep = (h & jnp.uint32(0x00FFFFFF)) >= jnp.uint32(thresh)
        scale = jnp.asarray(1.0 / (1.0 - p), dtype=x.dtype)
        x = jnp.where(keep, x * scale, jnp.zeros_like(x))

    # y = x @ W^T: contract K of both operands directly (no transpose copy).
    y = lax.dot_general(x, w_ref[...],
                        dimension_numbers=(((1,), (1,)), ((), ())),
                        preferred_element_type=jnp.float32)
    y = y + b_ref[...].astype(jnp.float32)           # bias is [1, N_pad]
    o_ref[...] = y.astype(o_ref.dtype)


def base_head_forward(x, weight, bias, *, dropout=0.5, training=False, seed=0):
    """Pallas implementation of BaseHead.forward.

    x:      [B, input_dim]
    weight: [output_dim, input_dim]   (PyTorch nn.Linear layout)
    bias:   [output_dim]
    returns [B, output_dim]
    """
    B, K = x.shape
    N = weight.shape[0]

    # Lane-dense output: pad output_dim to a multiple of 128, slice afterwards.
    N_pad = _round_up(N, 128)
    # Batch tile: multiple of 8 sublanes; x/out tiles stream over the grid
    # while the (small) weight/bias blocks stay VMEM-resident.
    TB = min(256, _round_up(B, 8))
    B_pad = _round_up(B, TB)

    x_p = x if B_pad == B else jnp.pad(x, ((0, B_pad - B), (0, 0)))
    w_p = weight if N_pad == N else jnp.pad(weight, ((0, N_pad - N), (0, 0)))
    b_p = (bias if N_pad == N else jnp.pad(bias, (0, N_pad - N))).reshape(1, N_pad)

    seed_mix = (int(seed) * _MIX1 + 0x1B873593) & 0xFFFFFFFF
    kernel = functools.partial(_base_head_kernel, p=float(dropout),
                               training=bool(training), seed_mix=seed_mix,
                               tile_b=TB, k_dim=K)

    out = pl.pallas_call(
        kernel,
        out_shape=jax.ShapeDtypeStruct((B_pad, N_pad), x.dtype),
        grid_spec=pltpu.PrefetchScalarGridSpec(
            num_scalar_prefetch=0,
            grid=(B_pad // TB,),
            in_specs=[
                pl.BlockSpec((TB, K), lambda i: (i, 0)),      # x tile streams
                pl.BlockSpec((N_pad, K), lambda i: (0, 0)),   # weight resident
                pl.BlockSpec((1, N_pad), lambda i: (0, 0)),   # bias resident
            ],
            out_specs=pl.BlockSpec((TB, N_pad), lambda i: (i, 0)),
        ),
        compiler_params=pltpu.CompilerParams(
            dimension_semantics=("parallel",)),
    )(x_p, w_p, b_p)
    return out[:B, :N]


def _dropout_mask_ref(B, K, seed, p):
    """Pure-JAX replica of the in-kernel hash (for correctness checking)."""
    thresh = int(round(p * (1 << 24)))
    seed_mix = (int(seed) * _MIX1 + 0x1B873593) & 0xFFFFFFFF
    rows = jnp.arange(B, dtype=jnp.uint32)[:, None]
    cols = jnp.arange(K, dtype=jnp.uint32)[None, :]
    h = rows * jnp.uint32(K) + cols + jnp.uint32(seed_mix)
    h = h * jnp.uint32(_MIX1)
    h = (h ^ (h >> 16)) * jnp.uint32(_MIX2)
    h = (h ^ (h >> 13)) * jnp.uint32(_MIX3)
    h = h ^ (h >> 16)
    return (h & jnp.uint32(0x00FFFFFF)) >= jnp.uint32(thresh)


if __name__ == "__main__":
    # Small shapes consistent with the module: input_dim=32, output_dim=16, B=8.
    B, input_dim, output_dim = 8, 32, 16
    p = 0.5
    key = jax.random.PRNGKey(0)
    kx, kw, kb = jax.random.split(key, 3)

    x = jax.random.normal(kx, (B, input_dim), dtype=jnp.float32)
    bound = 1.0 / (input_dim ** 0.5)
    weight = jax.random.uniform(kw, (output_dim, input_dim),
                                minval=-bound, maxval=bound, dtype=jnp.float32)
    bias = jax.random.uniform(kb, (output_dim,),
                              minval=-bound, maxval=bound, dtype=jnp.float32)

    # Eval mode (dropout = identity): must match the dense linear exactly.
    out_eval = jax.block_until_ready(
        base_head_forward(x, weight, bias, dropout=p, training=False))
    ref_eval = x @ weight.T + bias
    assert out_eval.shape == (B, output_dim)
    assert jnp.allclose(out_eval, ref_eval, atol=1e-5, rtol=1e-5)

    # Training mode: exercise in-kernel dropout; compare against a pure-JAX
    # reference that reuses the same deterministic hash mask.
    seed = 123
    out_train = jax.block_until_ready(
        base_head_forward(x, weight, bias, dropout=p, training=True, seed=seed))
    mask = _dropout_mask_ref(B, input_dim, seed, p)
    x_drop = jnp.where(mask, x * (1.0 / (1.0 - p)), 0.0)
    ref_train = x_drop @ weight.T + bias
    assert out_train.shape == (B, output_dim)
    assert bool(jnp.all(jnp.isfinite(out_train)))
    assert jnp.allclose(out_train, ref_train, atol=1e-4, rtol=1e-4)

    print("KERNEL_OK")
</pallas_src>

<mosaic_0001>
module attributes {stable_mosaic.version = 11 : i64} {
  func.func @_base_head_kernel(%arg0: i32, %arg1: memref<8x32xf32, #tpu.memory_space<vmem>>, %arg2: memref<128x32xf32, #tpu.memory_space<vmem>>, %arg3: memref<1x128xf32, #tpu.memory_space<vmem>>, %arg4: memref<8x128xf32, #tpu.memory_space<vmem>>) attributes {dimension_semantics = [#tpu.dimension_semantics<parallel>], iteration_bounds = array<i64: 1>, scalar_prefetch = 0 : i64, scratch_operands = 0 : i64, tpu.core_type = #tpu.core_type<tc>, window_params = [{transform_indices = @transform_0, window_bounds = array<i64: 8, 32>}, {pipeline_mode = #tpu.pipeline_mode<synchronous>, transform_indices = @transform_1, window_bounds = array<i64: 128, 32>}, {pipeline_mode = #tpu.pipeline_mode<synchronous>, transform_indices = @transform_2, window_bounds = array<i64: 1, 128>}, {transform_indices = @transform_3, window_bounds = array<i64: 8, 128>}]} {
    %c0 = arith.constant 0 : index
    %c0_0 = arith.constant 0 : index
    %0 = vector.load %arg1[%c0, %c0_0] : memref<8x32xf32, #tpu.memory_space<vmem>>, vector<8x32xf32>
    %c0_1 = arith.constant 0 : index
    %c0_2 = arith.constant 0 : index
    %1 = vector.load %arg2[%c0_1, %c0_2] : memref<128x32xf32, #tpu.memory_space<vmem>>, vector<128x32xf32>
    %cst = arith.constant dense<0.000000e+00> : vector<8x128xf32>
    %2 = tpu.matmul %0, %1, %cst {dimension_numbers = #tpu.dot_dimension_numbers<[1], [1], [0], [0], [0, 0, 1, 0], [], []>} : vector<8x32xf32>, vector<128x32xf32>, vector<8x128xf32> -> vector<8x128xf32>
    %c0_3 = arith.constant 0 : index
    %c0_4 = arith.constant 0 : index
    %3 = vector.load %arg3[%c0_3, %c0_4] : memref<1x128xf32, #tpu.memory_space<vmem>>, vector<1x128xf32>
    %4 = vector.broadcast %3 : vector<1x128xf32> to vector<8x128xf32>
    %5 = arith.addf %2, %4 : vector<8x128xf32>
    %c0_5 = arith.constant 0 : index
    %c0_6 = arith.constant 0 : index
    %6 = vector.load %arg4[%c0_5, %c0_6] : memref<8x128xf32, #tpu.memory_space<vmem>>, vector<8x128xf32>
    tpu.vector_store %arg4[%c0_5, %c0_6], %5 {strides = array<i32>} : memref<8x128xf32, #tpu.memory_space<vmem>>, vector<8x128xf32>,
    return
  }
  func.func @transform_0(%arg0: i32) -> (i32, i32) {
    %c0_i32 = arith.constant 0 : i32
    %c0_i32_0 = arith.constant 0 : i32
    return %arg0, %c0_i32 : i32, i32
  }
  func.func @transform_1(%arg0: i32) -> (i32, i32) {
    %c0_i32 = arith.constant 0 : i32
    %c0_i32_0 = arith.constant 0 : i32
    %c0_i32_1 = arith.constant 0 : i32
    return %c0_i32, %c0_i32_0 : i32, i32
  }
  func.func @transform_2(%arg0: i32) -> (i32, i32) {
    %c0_i32 = arith.constant 0 : i32
    %c0_i32_0 = arith.constant 0 : i32
    %c0_i32_1 = arith.constant 0 : i32
    return %c0_i32, %c0_i32_0 : i32, i32
  }
  func.func @transform_3(%arg0: i32) -> (i32, i32) {
    %c0_i32 = arith.constant 0 : i32
    %c0_i32_0 = arith.constant 0 : i32
    return %arg0, %c0_i32 : i32, i32
  }
}

</mosaic_0001>

<bundles_post_ra>
// kernel: tpu_custom_call.1
= control target key start
LH: loop header
LB: loop body
LE: loop exit
PB: predicated region body
PF: predicated region fallthrough
CT: control target
= control target key end

     0   :  { %vm39_vm0 = vcmask 261120   ;;  %v271_v1 = vmov 0.0   ;;  %vm272_vm1 = vmmov 0   ;;  %s368_s0 = inlined_call_operand.vmem [shape: f32[8,32], index: 0, kind: input, shape index: {}]   ;;  %s369_s1 = inlined_call_operand.vmem [shape: f32[128,32], index: 1, kind: input, shape index: {}]   ;;  %s370_s2 = inlined_call_operand.vmem [shape: f32[1,128], index: 2, kind: input, shape index: {}]   ;;  %s371_s3 = inlined_call_operand.hbm [shape: f32[8,128], index: 3, kind: output, shape index: {}]  }
   0x1   :  { %v31_v0 = vld [vmem:[%s369_s1 + $0x78] sm:$0xff]  ;;  %211 = vmatprep.subr.mxu0 %v271_v1  ;;  %243 = vmatprep.mubr.msk.f32.mxu0 %vm272_vm1, %v271_v1  ;;  %v30_v2 = vld [vmem:[%s369_s1 + $0x70] sm:$0xff] }
   0x2   :  { %212 = vmatpush3.xpose.msk.msra.mxu0 %vm39_vm0, %v31_v0 }
   0x3   :  { %213 = vmatprep.subr.mxu0 %v271_v1 }
   0x6   :  { %214 = vmatpush3.xpose.msk.msra.mxu0 %vm39_vm0, %v30_v2 }
   0x7   :  { %8 = vsyncpa [#allocation3], 0  ;;  %215 = vmatprep.subr.mxu0 %v271_v1  ;;  %v29_v3 = vld [vmem:[%s369_s1 + $0x68] sm:$0xff]  ;;  %v28_v4 = vld [vmem:[%s369_s1 + $0x60] sm:$0xff]  ;;  %s273_s21 = smov [#allocation2]  }
   0x8   :  { %v27_v5 = vld [vmem:[%s369_s1 + $0x58] sm:$0xff]  ;;  %v26_v6 = vld [vmem:[%s369_s1 + $0x50] sm:$0xff]  ;;  %v25_v7 = vld [vmem:[%s369_s1 + $0x48] sm:$0xff]  ;;  %s168_s22 = sshll.u32 %s273_s21, 4  ;;  %s169_s22 = int_to_ptr.vmem [resolvable:$true] %s168_s22 }
   0x9   :  { %v24_v8 = vld [vmem:[%s369_s1 + $0x40] sm:$0xff]  ;;  %v23_v9 = vld [vmem:[%s369_s1 + $0x38] sm:$0xff]  ;;  %v22_v10 = vld [vmem:[%s369_s1 + $0x30] sm:$0xff]  ;;  %p254_p1 = scmp.lt.s32.totalorder %s169_s22, %s169_s22 }
   0xa   :  { %216 = vmatpush3.xpose.msk.msra.mxu0 %vm39_vm0, %v29_v3  ;;  %v21_v11 = vld [vmem:[%s369_s1 + $0x28] sm:$0xff]  ;;  %v20_v12 = vld [vmem:[%s369_s1 + $0x20] sm:$0xff]  ;;  %v19_v13 = vld [vmem:[%s369_s1 + $0x18] sm:$0xff] }
   0xb   :  { %217 = vmatprep.subr.mxu0 %v271_v1  ;;  %v18_v14 = vld [vmem:[%s369_s1 + $0x10] sm:$0xff]  ;;  %v17_v15 = vld [vmem:[%s369_s1 + $0x8] sm:$0xff]  ;;  %v16_v16 = vld [vmem:[%s369_s1] sm:$0xff]  ;;  %s249_s1 = scalar_lea.vmem %s169_s22, 128 }
   0xc   :  { %v15_v17 = vld [vmem:[%s368_s0] sm:$0xff]  ;;  %p250_p0 = scmp.ne.s32.totalorder %s169_s22, %s249_s1  ;;  %p255_p2 = scmp.lt.s32.totalorder %s249_s1, %s249_s1 }
   0xd   :  { %v176_v18 = vld [vmem:[%s370_s2] ss:$0 sm:$0xff] }
   0xe   :  { %218 = vmatpush3.xpose.msk.msra.mxu0 %vm39_vm0, %v28_v4  ;;  %p256_p3 = por %p255_p2, %p254_p1 }
   0xf   :  { %219 = vmatprep.subr.mxu0 %v271_v1 }
  0x10   :  { %p257_p4 = pnand %p256_p3, %p250_p0 }
  0x12   :  { %220 = vmatpush3.xpose.msk.msra.mxu0 %vm39_vm0, %v27_v5 }
  0x13   :  { %221 = vmatprep.subr.mxu0 %v271_v1 }
  0x16   :  { %222 = vmatpush3.xpose.msk.msra.mxu0 %vm39_vm0, %v26_v6 }
  0x17   :  { %223 = vmatprep.subr.mxu0 %v271_v1 }
  0x1a   :  { %224 = vmatpush3.xpose.msk.msra.mxu0 %vm39_vm0, %v25_v7 }
  0x1b   :  { %225 = vmatprep.subr.mxu0 %v271_v1 }
  0x1e   :  { %226 = vmatpush3.xpose.msk.msra.mxu0 %vm39_vm0, %v24_v8 }
  0x1f   :  { %227 = vmatprep.subr.mxu0 %v271_v1 }
  0x22   :  { %228 = vmatpush3.xpose.msk.msra.mxu0 %vm39_vm0, %v23_v9 }
  0x23   :  { %229 = vmatprep.subr.mxu0 %v271_v1 }
  0x26   :  { %230 = vmatpush3.xpose.msk.msra.mxu0 %vm39_vm0, %v22_v10 }
  0x27   :  { %231 = vmatprep.subr.mxu0 %v271_v1 }
  0x2a   :  { %232 = vmatpush3.xpose.msk.msra.mxu0 %vm39_vm0, %v21_v11 }
  0x2b   :  { %233 = vmatprep.subr.mxu0 %v271_v1 }
  0x2e   :  { %234 = vmatpush3.xpose.msk.msra.mxu0 %vm39_vm0, %v20_v12 }
  0x2f   :  { %235 = vmatprep.subr.mxu0 %v271_v1 }
  0x32   :  { %236 = vmatpush3.xpose.msk.msra.mxu0 %vm39_vm0, %v19_v13 }
  0x33   :  { %237 = vmatprep.subr.mxu0 %v271_v1 }
  0x36   :  { %238 = vmatpush3.xpose.msk.msra.mxu0 %vm39_vm0, %v18_v14 }
  0x37   :  { %239 = vmatprep.subr.mxu0 %v271_v1 }
  0x3a   :  { %240 = vmatpush3.xpose.msk.msra.mxu0 %vm39_vm0, %v17_v15 }
  0x3b   :  { %241 = vmatprep.subr.mxu0 %v271_v1 }
  0x3e   :  { %242 = vmatpush3.xpose.msk.msra.mxu0 %vm39_vm0, %v16_v16 }
  0x41   :  { %244 = vmatmul.mubr.msk.f32.vlgmr.msra.gmra.mxu0 %vm39_vm0, %v15_v17 }
 0x101   :  { %v157_v19 = vpop.f32.mrf.mxu0 }
 0x102   :  { %v158_v20 = vadd.f32 %v176_v18, %v157_v19 }
 0x103   :  { %v245_v21 = vpop.f32.mrf.mxu0 }
 0x104   :  { %161 = vst [vmem:[#allocation2] sm:$0xff] %v158_v20 }
 0x105   :  { %260 = shalt.err (!%p257_p4)
}
 0x106   :  { %171 = dma.vmem_to_hbm [thread:$0]  %s169_s22, 128, %s371_s3, [#allocation3]  }
 0x107   :  { %269 = dma.done.wait [#allocation3], 128  }
 0x108   :  { %270 = vsyncadd [#allocation3], 4294967168 }
 0x109   :  { %175 = vsyncpa [#allocation3], 1 }

</bundles_post_ra>
